<compile_context>
chip_gen: v7x
topology: tpu7x:2x2x1
jax: 0.10.0
libtpu: 0.0.40
codegen_flags: <defaults>
</compile_context>

<pallas_src>
import numpy as np
import jax
import jax.numpy as jnp
from jax.experimental import pallas as pl
from jax.experimental.pallas import tpu as pltpu


def _pad_lanes(n):
    """Round n up to a multiple of 128 (TPU lane width)."""
    return n if n % 128 == 0 else (n // 128 + 1) * 128


def _tpu_vmem_and_cores():
    """Generation-aware (VMEM capacity, TensorCores per chip) with fallbacks."""
    vmem_cap = None
    cores = 1
    try:
        info = pltpu.get_tpu_info()
        for name in ("vmem_capacity_bytes", "vmem_bytes", "vmem_capacity"):
            v = getattr(info, name, None)
            if v:
                vmem_cap = int(v)
                break
        for name in ("num_cores", "tensorcores_per_chip",
                     "num_tensorcores", "core_count"):
            c = getattr(info, name, None)
            if c:
                cores = int(c)
                break
    except Exception:
        pass
    detected = vmem_cap is not None
    if not detected:
        vmem_cap = 64 << 20            # conservative: assume the smallest (v7x)
    if detected and vmem_cap <= (64 << 20):
        cores = max(cores, 2)          # 64 MiB VMEM => v7x (2 TC / chip)
    return vmem_cap, cores


# -----------------------------------------------------------------------------
# Fused kernel:
#   side_info[b, c,      k, l] = sin/cos(tp[b,l] * 10000^{-2i/C})   (c < C)
#   side_info[b, C+c,    k, l] = W[k, c]                  (batch invariant)
#   side_info[b, 2C,     k, l] = cond_mask[b, k, l]
#   noisy   = sqrt(a_t)*x + sqrt(1-a_t)*eps               (diff_dec input)
#   enc_in  = cond_mask * x                               (diff_enc input)
#   res_c   = eps * cond_mask                             (predicted == 0)
#   res_t   = eps * (observed_mask - cond_mask)
# Row tensors are lane-dense (B, Npad); side_info is lane-flat
# (B, side_dim*Npad) so every channel store is a full-lane aligned store.
# -----------------------------------------------------------------------------
def _make_fused_call(B, K, L, C, N, Np, pe_inv):
    SD = 2 * C + 1
    CN = C * Np
    vmem_cap, cores = _tpu_vmem_and_cores()

    # Bytes per batch row:
    #   streams (double-buffered, 2x): 5 row inputs (tp, cond_mask, obs_mask,
    #     data, noise) + (SD + 4) row outputs, all (_, Np) f32.
    #   scratch (single copy, 1x): live per-channel compute slabs.
    stream_row = 4 * Np * (5 + SD + 4)
    scratch_row = 4 * Np * 3
    invariant = 2 * 4 * CN              # constant-index feature slab, 2 buffers
    fixed = 2 << 20                     # coef blocks, padding, misc slack

    budget = int(0.35 * vmem_cap)       # ~45 MiB on v5e/v6e, ~22 MiB on v7x
    usable = max(budget - invariant - fixed, 2 * stream_row + scratch_row)
    tb = usable // (2 * stream_row + scratch_row)
    if tb >= B:
        tb = B
        if cores >= 2 and B >= 16:
            # Only on multi-TensorCore chips (v7x): keep >= 2 grid steps so
            # both cores get work.  On v5e/v6e (1 TC) keep the full tile.
            tb = max(8, ((B // 2) // 8) * 8)
    elif B <= 8:
        tb = B                           # block dim must be mult-of-8 or full
    else:
        tb = max(8, (tb // 8) * 8)
    # TODO(synk): for extreme K*L where even tb=8 overflows VMEM, an extra
    # lane-tiling grid axis over Np would be needed (not implemented here).

    needed = 2 * tb * stream_row + tb * scratch_row + invariant + fixed
    vmem_limit = int(min(int(0.9 * vmem_cap),
                         max(needed + (8 << 20), 32 << 20)))

    grid = (pl.cdiv(B, tb),)
    row_blk = pl.BlockSpec((tb, Np), lambda r: (r, 0))
    coef_blk = pl.BlockSpec((tb, 1), lambda r: (r, 0))
    feat_blk = pl.BlockSpec((1, CN), lambda r: (0, 0))      # constant index:
    side_blk = pl.BlockSpec((tb, SD * Np), lambda r: (r, 0))  # fetched once

    inv = [float(v) for v in np.asarray(pe_inv, np.float32)]

    def kernel(feat_ref, tp_ref, cm_ref, om_ref, data_ref, noise_ref,
               ca_ref, cn_ref,
               side_ref, noisy_ref, enc_ref, rc_ref, rt_ref):
        # ---- side_info: [time embed | feature embed | cond_mask] ------------
        # One lane-aligned (tb, Np) store per channel: unmasked full-lane
        # stores, live temporaries bounded to a single slab.
        tp = tp_ref[...]                                       # (tb, Np)
        for c in range(C):
            arg = tp * inv[c]                                  # host-folded const
            val = jnp.sin(arg) if c % 2 == 0 else jnp.cos(arg)
            side_ref[:, c * Np:(c + 1) * Np] = val
        for c in range(C):                                     # batch invariant
            row = feat_ref[:, c * Np:(c + 1) * Np]             # (1, Np)
            side_ref[:, (C + c) * Np:(C + c + 1) * Np] = jnp.broadcast_to(
                row, (tb, Np))
        cm = cm_ref[...]
        side_ref[:, 2 * C * Np:(2 * C + 1) * Np] = cm

        # ---- diffusion noising + residuals ----------------------------------
        data = data_ref[...]
        eps = noise_ref[...]
        noisy_ref[...] = ca_ref[...] * data + cn_ref[...] * eps  # diff_dec in
        enc_ref[...] = cm * data                                  # diff_enc in
        # TODO(synk): diff_enc / diff_dec source is not part of the provided
        # module; `predicted` is identically zero, so (noise - predicted) == noise.
        rc_ref[...] = eps * cm
        rt_ref[...] = eps * (om_ref[...] - cm)

    out_shapes = (
        jax.ShapeDtypeStruct((B, SD * Np), jnp.float32),   # side_info (flat)
        jax.ShapeDtypeStruct((B, Np), jnp.float32),        # noisy_data
        jax.ShapeDtypeStruct((B, Np), jnp.float32),        # enc_input
        jax.ShapeDtypeStruct((B, Np), jnp.float32),        # residual_cond
        jax.ShapeDtypeStruct((B, Np), jnp.float32),        # residual_target
    )
    return pl.pallas_call(
        kernel,
        out_shape=out_shapes,
        grid=grid,
        in_specs=[feat_blk, row_blk, row_blk, row_blk, row_blk, row_blk,
                  coef_blk, coef_blk],
        out_specs=[side_blk, row_blk, row_blk, row_blk, row_blk],
        compiler_params=pltpu.CompilerParams(
            dimension_semantics=("parallel",),
            vmem_limit_bytes=vmem_limit),
    )


# -----------------------------------------------------------------------------
# Pure-JAX mirror of DIFF_base.get_side_info (used only for the self-check).
# -----------------------------------------------------------------------------
def _side_info_reference(observed_tp, cond_mask, embed_weight, C):
    B, K, L = cond_mask.shape
    pos = observed_tp.astype(jnp.float32)[:, :, None]             # (B, L, 1)
    div_term = jnp.asarray(
        1.0 / np.power(10000.0, np.arange(0, C, 2) / C), jnp.float32)
    pe = jnp.zeros((B, L, C), jnp.float32)
    pe = pe.at[:, :, 0::2].set(jnp.sin(pos * div_term))
    pe = pe.at[:, :, 1::2].set(jnp.cos(pos * div_term))
    time_embed = jnp.broadcast_to(pe[:, :, None, :], (B, L, K, C))
    feature_embed = jnp.broadcast_to(embed_weight[None, None], (B, L, K, C))
    si = jnp.concatenate([time_embed, feature_embed], axis=-1)    # (B,L,K,2C)
    si = jnp.transpose(si, (0, 3, 2, 1))                          # (B,2C,K,L)
    return jnp.concatenate([si, cond_mask[:, None]], axis=1)


# -----------------------------------------------------------------------------
# DIFF_base equivalent (JAX / Pallas)
# -----------------------------------------------------------------------------
class DiffBasePallas:
    def __init__(self, target_dim, config, key):
        self.target_dim = target_dim
        self.channels = config["diffusion"]["channels"]
        self.pred_length = config["model"]["pred_length"]
        self.obs_mask_rank = config["model"]["obs_mask_rank"]
        self.emb_time_dim = self.channels
        self.emb_feature_dim = self.channels
        self.is_unconditional = config["model"]["is_unconditional"]
        self.target_strategy = config["model"]["target_strategy"]
        self.input_size = config["model"]["input_size"]
        self.emb_total_dim = self.emb_time_dim + self.emb_feature_dim
        if not self.is_unconditional:
            self.emb_total_dim += 1

        cd = config["diffusion"]
        self.num_steps = cd["num_steps"]
        if cd["schedule"] == "quad":
            beta = np.linspace(cd["beta_start"] ** 0.5,
                               cd["beta_end"] ** 0.5, self.num_steps) ** 2
        else:
            beta = np.linspace(cd["beta_start"], cd["beta_end"], self.num_steps)
        self.beta = beta
        self.alpha_hat = 1.0 - beta
        self.alpha = jnp.asarray(np.cumprod(self.alpha_hat), dtype=jnp.float32)

        # nn.Embedding(target_dim, emb_feature_dim): weight ~ N(0, 1).
        self.embed_weight = jax.random.normal(
            key, (target_dim, self.emb_feature_dim), dtype=jnp.float32)

        # ---- host-precomputed positional-encoding frequencies ----------------
        # inv[c] = 10000^{-2i/C}; parity (sin vs cos) is handled at trace time.
        C = self.emb_time_dim
        div = (1.0 / np.power(10000.0, np.arange(0, C, 2) / C)).astype(np.float32)
        inv = np.zeros((C,), np.float32)
        inv[0::2] = div
        inv[1::2] = div[: C // 2]
        self.pe_inv = inv

        # ---- batch-invariant feature-embedding slab, built once --------------
        self._feat_built_for = (self.target_dim, self.input_size)
        self._feat_flat = self._make_feat_flat(self.target_dim, self.input_size)

    def _make_feat_flat(self, K, L):
        """(1, C*Npad) lane-flat slab: feat[c, k*L+l] = W[k, c], lane padded."""
        C = self.emb_feature_dim
        N = K * L
        Np = _pad_lanes(N)
        f = jnp.broadcast_to(
            jnp.transpose(self.embed_weight)[:, :, None], (C, K, L)).reshape(C, N)
        if Np != N:
            f = jnp.pad(f, ((0, 0), (0, Np - N)))
        return f.reshape(1, C * Np)

    # --- random conditional mask (plain JAX: RNG + per-sample ranking) --------
    def get_randmask(self, key, observed_mask):
        B = observed_mask.shape[0]
        k1, k2 = jax.random.split(key)
        rand_for_mask = (jax.random.uniform(k1, observed_mask.shape,
                                            dtype=jnp.float32) * observed_mask)
        flat = rand_for_mask.reshape(B, -1)
        sample_ratio = (jax.random.uniform(k2, (B,), dtype=jnp.float32)
                        * self.obs_mask_rank)
        num_observed = observed_mask.reshape(B, -1).sum(axis=1)
        num_masked = jnp.round(num_observed * sample_ratio).astype(jnp.int32)
        order = jnp.argsort(-flat, axis=1)        # descending (torch.topk)
        ranks = jnp.argsort(order, axis=1)        # rank of each element
        flat = jnp.where(ranks < num_masked[:, None], -1.0, flat)
        return (flat > 0).reshape(observed_mask.shape).astype(jnp.float32)

    def get_mid_wp_mask(self, key, observed_mask, is_train):
        # Single elementwise multiply -> plain JAX so it fuses with the
        # rand-mask XLA ops.
        cond_mask = observed_mask
        if is_train == 1:
            cond_mask = self.get_randmask(key, observed_mask)
        wp_num = 2
        _, K, L = observed_mask.shape
        center_start = (L - self.pred_length) // 2
        if (L - self.pred_length) % 2 != 0:
            center_start += 1
        pred_mask = np.ones((1, K, L), dtype=np.float32)
        pred_mask[0, wp_num, center_start:center_start + self.pred_length] = 0.0
        return cond_mask * jnp.asarray(pred_mask)

    @staticmethod
    def process_data(batch):
        return (batch["observed_data"], batch["observed_mask"],
                batch["observed_tp"], batch["gt_mask"],
                batch["for_pattern_mask"], batch["cut_length"])

    def forward(self, batch, key, is_train=1, set_t=-1):
        (observed_data, observed_mask, observed_tp,
         gt_mask, _, _) = self.process_data(batch)
        k_mask, k_t, k_noise = jax.random.split(key, 3)

        if is_train == 0:
            cond_mask = gt_mask
            if self.target_strategy == "random_mid_wp":
                cond_mask = self.get_mid_wp_mask(k_mask, gt_mask, is_train)
        elif self.target_strategy == "random_mid_wp":
            cond_mask = self.get_mid_wp_mask(k_mask, observed_mask, is_train)
        else:
            cond_mask = self.get_randmask(k_mask, observed_mask)

        B, K, L = observed_data.shape
        C = self.emb_time_dim
        N = K * L
        Np = _pad_lanes(N)

        # diffusion step + per-sample sqrt(alpha) coefficients (tiny, plain JAX)
        if is_train != 1:
            t = jnp.full((B,), set_t, dtype=jnp.int32)
        else:
            t = jax.random.randint(k_t, (B,), 0, self.num_steps)
        current_alpha = self.alpha[t]
        coef_a = jnp.sqrt(current_alpha).reshape(B, 1).astype(jnp.float32)
        coef_n = jnp.sqrt(1.0 - current_alpha).reshape(B, 1).astype(jnp.float32)
        noise = jax.random.normal(k_noise, (B, K, L), dtype=jnp.float32)

        # --- glue: flatten (B, K, L) -> lane-dense, lane-padded (B, Np) -------
        def flat_pad(x):
            xf = x.astype(jnp.float32).reshape(B, N)
            if Np != N:
                xf = jnp.pad(xf, ((0, 0), (0, Np - N)))
            return xf

        tp_flat = flat_pad(jnp.broadcast_to(
            observed_tp.astype(jnp.float32)[:, None, :], (B, K, L)))
        cm_flat = flat_pad(cond_mask)
        om_flat = flat_pad(observed_mask)
        data_flat = flat_pad(observed_data)
        noise_flat = flat_pad(noise)

        feat_flat = self._feat_flat
        if self._feat_built_for != (K, L):
            feat_flat = self._make_feat_flat(K, L)

        fused = _make_fused_call(B, K, L, C, N, Np, self.pe_inv)
        (side_flat, noisy_flat, enc_flat, rc_flat, rt_flat) = fused(
            feat_flat, tp_flat, cm_flat, om_flat, data_flat, noise_flat,
            coef_a, coef_n)

        SD = 2 * C + 1
        side = side_flat.reshape(B, SD, Np)
        if Np != N:
            side = side[:, :, :N]
            rc_flat = rc_flat[:, :N]
            rt_flat = rt_flat[:, :N]
        side_info = side.reshape(B, SD, K, L)
        residual_cond = rc_flat.reshape(B, K, L)
        residual_target = rt_flat.reshape(B, K, L)
        del noisy_flat, enc_flat      # would feed diff_dec / diff_enc
        return residual_cond, residual_target, side_info


# -----------------------------------------------------------------------------
if __name__ == "__main__":
    B, K, L = 2, 4, 16          # batch, features (target_dim), time length
    channels = 8

    config = {
        "diffusion": {"channels": channels, "num_steps": 10,
                      "schedule": "quad", "beta_start": 1e-4, "beta_end": 0.5},
        "model": {"pred_length": 4, "obs_mask_rank": 0.5,
                  "is_unconditional": False,
                  "target_strategy": "random_mid_wp", "input_size": L},
    }

    root = jax.random.PRNGKey(0)
    k_emb, k_data, k_obs, k_gt, k_fwd = jax.random.split(root, 5)

    model = DiffBasePallas(target_dim=K, config=config, key=k_emb)

    observed_data = jax.random.normal(k_data, (B, K, L), dtype=jnp.float32)
    observed_mask = (jax.random.uniform(k_obs, (B, K, L)) > 0.2).astype(jnp.float32)
    gt_mask = observed_mask * (jax.random.uniform(k_gt, (B, K, L)) > 0.1
                               ).astype(jnp.float32)
    observed_tp = jnp.broadcast_to(jnp.arange(L, dtype=jnp.float32), (B, L))
    batch = {
        "observed_data": observed_data,
        "observed_mask": observed_mask,
        "observed_tp": observed_tp,
        "gt_mask": gt_mask,
        "for_pattern_mask": observed_mask,
        "cut_length": jnp.zeros((B,), dtype=jnp.int32),
    }

    residual_cond, residual_target, side_info = model.forward(
        batch, k_fwd, is_train=1)
    jax.block_until_ready((residual_cond, residual_target, side_info))

    side_dim = 2 * channels + 1
    assert residual_cond.shape == (B, K, L)
    assert residual_target.shape == (B, K, L)
    assert side_info.shape == (B, side_dim, K, L)

    # --- correctness self-checks ---------------------------------------------
    # Replicate forward()'s RNG splits so cond_mask / noise are validated
    # INDEPENDENTLY of the kernel's own outputs.
    k_mask, k_t, k_noise = jax.random.split(k_fwd, 3)
    exp_cond_mask = model.get_mid_wp_mask(k_mask, observed_mask, 1)
    exp_noise = jax.random.normal(k_noise, (B, K, L), dtype=jnp.float32)

    # cond_mask channel of side_info is a pure copy -> must match exactly
    np.testing.assert_array_equal(np.asarray(side_info[:, -1]),
                                  np.asarray(exp_cond_mask))

    ref_side = _side_info_reference(observed_tp, exp_cond_mask,
                                    model.embed_weight, channels)
    np.testing.assert_allclose(np.asarray(side_info), np.asarray(ref_side),
                               rtol=1e-3, atol=1e-3)

    # predicted == 0 -> residuals are exactly noise * mask
    target_mask = observed_mask - exp_cond_mask
    np.testing.assert_allclose(np.asarray(residual_cond),
                               np.asarray(exp_noise * exp_cond_mask),
                               rtol=1e-6, atol=1e-6)
    np.testing.assert_allclose(np.asarray(residual_target),
                               np.asarray(exp_noise * target_mask),
                               rtol=1e-6, atol=1e-6)

    print("KERNEL_OK")
</pallas_src>

<mosaic_0001>
module attributes {stable_mosaic.version = 11 : i64} {
  func.func @kernel(%arg0: i32, %arg1: memref<1x1024xf32, #tpu.memory_space<vmem>>, %arg2: memref<2x128xf32, #tpu.memory_space<vmem>>, %arg3: memref<2x128xf32, #tpu.memory_space<vmem>>, %arg4: memref<2x128xf32, #tpu.memory_space<vmem>>, %arg5: memref<2x128xf32, #tpu.memory_space<vmem>>, %arg6: memref<2x128xf32, #tpu.memory_space<vmem>>, %arg7: memref<2x1xf32, #tpu.memory_space<vmem>>, %arg8: memref<2x1xf32, #tpu.memory_space<vmem>>, %arg9: memref<2x2176xf32, #tpu.memory_space<vmem>>, %arg10: memref<2x128xf32, #tpu.memory_space<vmem>>, %arg11: memref<2x128xf32, #tpu.memory_space<vmem>>, %arg12: memref<2x128xf32, #tpu.memory_space<vmem>>, %arg13: memref<2x128xf32, #tpu.memory_space<vmem>>) attributes {dimension_semantics = [#tpu.dimension_semantics<parallel>], iteration_bounds = array<i64: 1>, scalar_prefetch = 0 : i64, scratch_operands = 0 : i64, tpu.core_type = #tpu.core_type<tc>, window_params = [{pipeline_mode = #tpu.pipeline_mode<synchronous>, transform_indices = @transform_0, window_bounds = array<i64: 1, 1024>}, {transform_indices = @transform_1, window_bounds = array<i64: 2, 128>}, {transform_indices = @transform_2, window_bounds = array<i64: 2, 128>}, {transform_indices = @transform_3, window_bounds = array<i64: 2, 128>}, {transform_indices = @transform_4, window_bounds = array<i64: 2, 128>}, {transform_indices = @transform_5, window_bounds = array<i64: 2, 128>}, {transform_indices = @transform_6, window_bounds = array<i64: 2, 1>}, {transform_indices = @transform_7, window_bounds = array<i64: 2, 1>}, {transform_indices = @transform_8, window_bounds = array<i64: 2, 2176>}, {transform_indices = @transform_9, window_bounds = array<i64: 2, 128>}, {transform_indices = @transform_10, window_bounds = array<i64: 2, 128>}, {transform_indices = @transform_11, window_bounds = array<i64: 2, 128>}, {transform_indices = @transform_12, window_bounds = array<i64: 2, 128>}]} {
    %c0 = arith.constant 0 : index
    %c0_0 = arith.constant 0 : index
    %0 = vector.load %arg2[%c0, %c0_0] : memref<2x128xf32, #tpu.memory_space<vmem>>, vector<2x128xf32>
    %cst = arith.constant 1.000000e+00 : f32
    %1 = vector.broadcast %cst : f32 to vector<2x128xf32>
    %2 = arith.mulf %0, %1 : vector<2x128xf32>
    %3 = math.sin %2 : vector<2x128xf32>
    %c0_1 = arith.constant 0 : index
    %c0_2 = arith.constant 0 : index
    %4 = vector.load %arg9[%c0_1, %c0_2] : memref<2x2176xf32, #tpu.memory_space<vmem>>, vector<2x128xf32>
    tpu.vector_store %arg9[%c0_1, %c0_2], %3 {strides = array<i32>} : memref<2x2176xf32, #tpu.memory_space<vmem>>, vector<2x128xf32>,
    %cst_3 = arith.constant 1.000000e+00 : f32
    %5 = vector.broadcast %cst_3 : f32 to vector<2x128xf32>
    %6 = arith.mulf %0, %5 : vector<2x128xf32>
    %7 = math.cos %6 : vector<2x128xf32>
    %c0_4 = arith.constant 0 : index
    %c128 = arith.constant 128 : index
    %8 = vector.load %arg9[%c0_4, %c128] : memref<2x2176xf32, #tpu.memory_space<vmem>>, vector<2x128xf32>
    tpu.vector_store %arg9[%c0_4, %c128], %7 {strides = array<i32>} : memref<2x2176xf32, #tpu.memory_space<vmem>>, vector<2x128xf32>,
    %cst_5 = arith.constant 1.000000e-01 : f32
    %9 = vector.broadcast %cst_5 : f32 to vector<2x128xf32>
    %10 = arith.mulf %0, %9 : vector<2x128xf32>
    %11 = math.sin %10 : vector<2x128xf32>
    %c0_6 = arith.constant 0 : index
    %c256 = arith.constant 256 : index
    %12 = vector.load %arg9[%c0_6, %c256] : memref<2x2176xf32, #tpu.memory_space<vmem>>, vector<2x128xf32>
    tpu.vector_store %arg9[%c0_6, %c256], %11 {strides = array<i32>} : memref<2x2176xf32, #tpu.memory_space<vmem>>, vector<2x128xf32>,
    %cst_7 = arith.constant 1.000000e-01 : f32
    %13 = vector.broadcast %cst_7 : f32 to vector<2x128xf32>
    %14 = arith.mulf %0, %13 : vector<2x128xf32>
    %15 = math.cos %14 : vector<2x128xf32>
    %c0_8 = arith.constant 0 : index
    %c384 = arith.constant 384 : index
    %16 = vector.load %arg9[%c0_8, %c384] : memref<2x2176xf32, #tpu.memory_space<vmem>>, vector<2x128xf32>
    tpu.vector_store %arg9[%c0_8, %c384], %15 {strides = array<i32>} : memref<2x2176xf32, #tpu.memory_space<vmem>>, vector<2x128xf32>,
    %cst_9 = arith.constant 0.00999999977 : f32
    %17 = vector.broadcast %cst_9 : f32 to vector<2x128xf32>
    %18 = arith.mulf %0, %17 : vector<2x128xf32>
    %19 = math.sin %18 : vector<2x128xf32>
    %c0_10 = arith.constant 0 : index
    %c512 = arith.constant 512 : index
    %20 = vector.load %arg9[%c0_10, %c512] : memref<2x2176xf32, #tpu.memory_space<vmem>>, vector<2x128xf32>
    tpu.vector_store %arg9[%c0_10, %c512], %19 {strides = array<i32>} : memref<2x2176xf32, #tpu.memory_space<vmem>>, vector<2x128xf32>,
    %cst_11 = arith.constant 0.00999999977 : f32
    %21 = vector.broadcast %cst_11 : f32 to vector<2x128xf32>
    %22 = arith.mulf %0, %21 : vector<2x128xf32>
    %23 = math.cos %22 : vector<2x128xf32>
    %c0_12 = arith.constant 0 : index
    %c640 = arith.constant 640 : index
    %24 = vector.load %arg9[%c0_12, %c640] : memref<2x2176xf32, #tpu.memory_space<vmem>>, vector<2x128xf32>
    tpu.vector_store %arg9[%c0_12, %c640], %23 {strides = array<i32>} : memref<2x2176xf32, #tpu.memory_space<vmem>>, vector<2x128xf32>,
    %cst_13 = arith.constant 1.000000e-03 : f32
    %25 = vector.broadcast %cst_13 : f32 to vector<2x128xf32>
    %26 = arith.mulf %0, %25 : vector<2x128xf32>
    %27 = math.sin %26 : vector<2x128xf32>
    %c0_14 = arith.constant 0 : index
    %c768 = arith.constant 768 : index
    %28 = vector.load %arg9[%c0_14, %c768] : memref<2x2176xf32, #tpu.memory_space<vmem>>, vector<2x128xf32>
    tpu.vector_store %arg9[%c0_14, %c768], %27 {strides = array<i32>} : memref<2x2176xf32, #tpu.memory_space<vmem>>, vector<2x128xf32>,
    %cst_15 = arith.constant 1.000000e-03 : f32
    %29 = vector.broadcast %cst_15 : f32 to vector<2x128xf32>
    %30 = arith.mulf %0, %29 : vector<2x128xf32>
    %31 = math.cos %30 : vector<2x128xf32>
    %c0_16 = arith.constant 0 : index
    %c896 = arith.constant 896 : index
    %32 = vector.load %arg9[%c0_16, %c896] : memref<2x2176xf32, #tpu.memory_space<vmem>>, vector<2x128xf32>
    tpu.vector_store %arg9[%c0_16, %c896], %31 {strides = array<i32>} : memref<2x2176xf32, #tpu.memory_space<vmem>>, vector<2x128xf32>,
    %c0_17 = arith.constant 0 : index
    %c0_18 = arith.constant 0 : index
    %33 = vector.load %arg1[%c0_17, %c0_18] : memref<1x1024xf32, #tpu.memory_space<vmem>>, vector<1x128xf32>
    %34 = vector.shape_cast %33 : vector<1x128xf32> to vector<1x128xf32>
    %35 = vector.broadcast %34 : vector<1x128xf32> to vector<2x128xf32>
    %c0_19 = arith.constant 0 : index
    %c1024 = arith.constant 1024 : index
    %36 = vector.load %arg9[%c0_19, %c1024] : memref<2x2176xf32, #tpu.memory_space<vmem>>, vector<2x128xf32>
    tpu.vector_store %arg9[%c0_19, %c1024], %35 {strides = array<i32>} : memref<2x2176xf32, #tpu.memory_space<vmem>>, vector<2x128xf32>,
    %c0_20 = arith.constant 0 : index
    %c128_21 = arith.constant 128 : index
    %37 = vector.load %arg1[%c0_20, %c128_21] : memref<1x1024xf32, #tpu.memory_space<vmem>>, vector<1x128xf32>
    %38 = vector.shape_cast %37 : vector<1x128xf32> to vector<1x128xf32>
    %39 = vector.broadcast %38 : vector<1x128xf32> to vector<2x128xf32>
    %c0_22 = arith.constant 0 : index
    %c1152 = arith.constant 1152 : index
    %40 = vector.load %arg9[%c0_22, %c1152] : memref<2x2176xf32, #tpu.memory_space<vmem>>, vector<2x128xf32>
    tpu.vector_store %arg9[%c0_22, %c1152], %39 {strides = array<i32>} : memref<2x2176xf32, #tpu.memory_space<vmem>>, vector<2x128xf32>,
    %c0_23 = arith.constant 0 : index
    %c256_24 = arith.constant 256 : index
    %41 = vector.load %arg1[%c0_23, %c256_24] : memref<1x1024xf32, #tpu.memory_space<vmem>>, vector<1x128xf32>
    %42 = vector.shape_cast %41 : vector<1x128xf32> to vector<1x128xf32>
    %43 = vector.broadcast %42 : vector<1x128xf32> to vector<2x128xf32>
    %c0_25 = arith.constant 0 : index
    %c1280 = arith.constant 1280 : index
    %44 = vector.load %arg9[%c0_25, %c1280] : memref<2x2176xf32, #tpu.memory_space<vmem>>, vector<2x128xf32>
    tpu.vector_store %arg9[%c0_25, %c1280], %43 {strides = array<i32>} : memref<2x2176xf32, #tpu.memory_space<vmem>>, vector<2x128xf32>,
    %c0_26 = arith.constant 0 : index
    %c384_27 = arith.constant 384 : index
    %45 = vector.load %arg1[%c0_26, %c384_27] : memref<1x1024xf32, #tpu.memory_space<vmem>>, vector<1x128xf32>
    %46 = vector.shape_cast %45 : vector<1x128xf32> to vector<1x128xf32>
    %47 = vector.broadcast %46 : vector<1x128xf32> to vector<2x128xf32>
    %c0_28 = arith.constant 0 : index
    %c1408 = arith.constant 1408 : index
    %48 = vector.load %arg9[%c0_28, %c1408] : memref<2x2176xf32, #tpu.memory_space<vmem>>, vector<2x128xf32>
    tpu.vector_store %arg9[%c0_28, %c1408], %47 {strides = array<i32>} : memref<2x2176xf32, #tpu.memory_space<vmem>>, vector<2x128xf32>,
    %c0_29 = arith.constant 0 : index
    %c512_30 = arith.constant 512 : index
    %49 = vector.load %arg1[%c0_29, %c512_30] : memref<1x1024xf32, #tpu.memory_space<vmem>>, vector<1x128xf32>
    %50 = vector.shape_cast %49 : vector<1x128xf32> to vector<1x128xf32>
    %51 = vector.broadcast %50 : vector<1x128xf32> to vector<2x128xf32>
    %c0_31 = arith.constant 0 : index
    %c1536 = arith.constant 1536 : index
    %52 = vector.load %arg9[%c0_31, %c1536] : memref<2x2176xf32, #tpu.memory_space<vmem>>, vector<2x128xf32>
    tpu.vector_store %arg9[%c0_31, %c1536], %51 {strides = array<i32>} : memref<2x2176xf32, #tpu.memory_space<vmem>>, vector<2x128xf32>,
    %c0_32 = arith.constant 0 : index
    %c640_33 = arith.constant 640 : index
    %53 = vector.load %arg1[%c0_32, %c640_33] : memref<1x1024xf32, #tpu.memory_space<vmem>>, vector<1x128xf32>
    %54 = vector.shape_cast %53 : vector<1x128xf32> to vector<1x128xf32>
    %55 = vector.broadcast %54 : vector<1x128xf32> to vector<2x128xf32>
    %c0_34 = arith.constant 0 : index
    %c1664 = arith.constant 1664 : index
    %56 = vector.load %arg9[%c0_34, %c1664] : memref<2x2176xf32, #tpu.memory_space<vmem>>, vector<2x128xf32>
    tpu.vector_store %arg9[%c0_34, %c1664], %55 {strides = array<i32>} : memref<2x2176xf32, #tpu.memory_space<vmem>>, vector<2x128xf32>,
    %c0_35 = arith.constant 0 : index
    %c768_36 = arith.constant 768 : index
    %57 = vector.load %arg1[%c0_35, %c768_36] : memref<1x1024xf32, #tpu.memory_space<vmem>>, vector<1x128xf32>
    %58 = vector.shape_cast %57 : vector<1x128xf32> to vector<1x128xf32>
    %59 = vector.broadcast %58 : vector<1x128xf32> to vector<2x128xf32>
    %c0_37 = arith.constant 0 : index
    %c1792 = arith.constant 1792 : index
    %60 = vector.load %arg9[%c0_37, %c1792] : memref<2x2176xf32, #tpu.memory_space<vmem>>, vector<2x128xf32>
    tpu.vector_store %arg9[%c0_37, %c1792], %59 {strides = array<i32>} : memref<2x2176xf32, #tpu.memory_space<vmem>>, vector<2x128xf32>,
    %c0_38 = arith.constant 0 : index
    %c896_39 = arith.constant 896 : index
    %61 = vector.load %arg1[%c0_38, %c896_39] : memref<1x1024xf32, #tpu.memory_space<vmem>>, vector<1x128xf32>
    %62 = vector.shape_cast %61 : vector<1x128xf32> to vector<1x128xf32>
    %63 = vector.broadcast %62 : vector<1x128xf32> to vector<2x128xf32>
    %c0_40 = arith.constant 0 : index
    %c1920 = arith.constant 1920 : index
    %64 = vector.load %arg9[%c0_40, %c1920] : memref<2x2176xf32, #tpu.memory_space<vmem>>, vector<2x128xf32>
    tpu.vector_store %arg9[%c0_40, %c1920], %63 {strides = array<i32>} : memref<2x2176xf32, #tpu.memory_space<vmem>>, vector<2x128xf32>,
    %c0_41 = arith.constant 0 : index
    %c0_42 = arith.constant 0 : index
    %65 = vector.load %arg3[%c0_41, %c0_42] : memref<2x128xf32, #tpu.memory_space<vmem>>, vector<2x128xf32>
    %c0_43 = arith.constant 0 : index
    %c2048 = arith.constant 2048 : index
    %66 = vector.load %arg9[%c0_43, %c2048] : memref<2x2176xf32, #tpu.memory_space<vmem>>, vector<2x128xf32>
    tpu.vector_store %arg9[%c0_43, %c2048], %65 {strides = array<i32>} : memref<2x2176xf32, #tpu.memory_space<vmem>>, vector<2x128xf32>,
    %c0_44 = arith.constant 0 : index
    %c0_45 = arith.constant 0 : index
    %67 = vector.load %arg5[%c0_44, %c0_45] : memref<2x128xf32, #tpu.memory_space<vmem>>, vector<2x128xf32>
    %c0_46 = arith.constant 0 : index
    %c0_47 = arith.constant 0 : index
    %68 = vector.load %arg6[%c0_46, %c0_47] : memref<2x128xf32, #tpu.memory_space<vmem>>, vector<2x128xf32>
    %c0_48 = arith.constant 0 : index
    %c0_49 = arith.constant 0 : index
    %69 = vector.load %arg7[%c0_48, %c0_49] : memref<2x1xf32, #tpu.memory_space<vmem>>, vector<2x1xf32>
    %70 = vector.broadcast %69 : vector<2x1xf32> to vector<2x128xf32>
    %71 = arith.mulf %70, %67 : vector<2x128xf32>
    %c0_50 = arith.constant 0 : index
    %c0_51 = arith.constant 0 : index
    %72 = vector.load %arg8[%c0_50, %c0_51] : memref<2x1xf32, #tpu.memory_space<vmem>>, vector<2x1xf32>
    %73 = vector.broadcast %72 : vector<2x1xf32> to vector<2x128xf32>
    %74 = arith.mulf %73, %68 : vector<2x128xf32>
    %75 = arith.addf %71, %74 : vector<2x128xf32>
    %c0_52 = arith.constant 0 : index
    %c0_53 = arith.constant 0 : index
    %76 = vector.load %arg10[%c0_52, %c0_53] : memref<2x128xf32, #tpu.memory_space<vmem>>, vector<2x128xf32>
    tpu.vector_store %arg10[%c0_52, %c0_53], %75 {strides = array<i32>} : memref<2x128xf32, #tpu.memory_space<vmem>>, vector<2x128xf32>,
    %77 = arith.mulf %65, %67 : vector<2x128xf32>
    %c0_54 = arith.constant 0 : index
    %c0_55 = arith.constant 0 : index
    %78 = vector.load %arg11[%c0_54, %c0_55] : memref<2x128xf32, #tpu.memory_space<vmem>>, vector<2x128xf32>
    tpu.vector_store %arg11[%c0_54, %c0_55], %77 {strides = array<i32>} : memref<2x128xf32, #tpu.memory_space<vmem>>, vector<2x128xf32>,
    %79 = arith.mulf %68, %65 : vector<2x128xf32>
    %c0_56 = arith.constant 0 : index
    %c0_57 = arith.constant 0 : index
    %80 = vector.load %arg12[%c0_56, %c0_57] : memref<2x128xf32, #tpu.memory_space<vmem>>, vector<2x128xf32>
    tpu.vector_store %arg12[%c0_56, %c0_57], %79 {strides = array<i32>} : memref<2x128xf32, #tpu.memory_space<vmem>>, vector<2x128xf32>,
    %c0_58 = arith.constant 0 : index
    %c0_59 = arith.constant 0 : index
    %81 = vector.load %arg4[%c0_58, %c0_59] : memref<2x128xf32, #tpu.memory_space<vmem>>, vector<2x128xf32>
    %82 = arith.subf %81, %65 : vector<2x128xf32>
    %83 = arith.mulf %68, %82 : vector<2x128xf32>
    %c0_60 = arith.constant 0 : index
    %c0_61 = arith.constant 0 : index
    %84 = vector.load %arg13[%c0_60, %c0_61] : memref<2x128xf32, #tpu.memory_space<vmem>>, vector<2x128xf32>
    tpu.vector_store %arg13[%c0_60, %c0_61], %83 {strides = array<i32>} : memref<2x128xf32, #tpu.memory_space<vmem>>, vector<2x128xf32>,
    return
  }
  func.func @transform_0(%arg0: i32) -> (i32, i32) {
    %c0_i32 = arith.constant 0 : i32
    %c0_i32_0 = arith.constant 0 : i32
    %c0_i32_1 = arith.constant 0 : i32
    return %c0_i32, %c0_i32_0 : i32, i32
  }
  func.func @transform_1(%arg0: i32) -> (i32, i32) {
    %c0_i32 = arith.constant 0 : i32
    %c0_i32_0 = arith.constant 0 : i32
    return %arg0, %c0_i32 : i32, i32
  }
  func.func @transform_2(%arg0: i32) -> (i32, i32) {
    %c0_i32 = arith.constant 0 : i32
    %c0_i32_0 = arith.constant 0 : i32
    return %arg0, %c0_i32 : i32, i32
  }
  func.func @transform_3(%arg0: i32) -> (i32, i32) {
    %c0_i32 = arith.constant 0 : i32
    %c0_i32_0 = arith.constant 0 : i32
    return %arg0, %c0_i32 : i32, i32
  }
  func.func @transform_4(%arg0: i32) -> (i32, i32) {
    %c0_i32 = arith.constant 0 : i32
    %c0_i32_0 = arith.constant 0 : i32
    return %arg0, %c0_i32 : i32, i32
  }
  func.func @transform_5(%arg0: i32) -> (i32, i32) {
    %c0_i32 = arith.constant 0 : i32
    %c0_i32_0 = arith.constant 0 : i32
    return %arg0, %c0_i32 : i32, i32
  }
  func.func @transform_6(%arg0: i32) -> (i32, i32) {
    %c0_i32 = arith.constant 0 : i32
    %c0_i32_0 = arith.constant 0 : i32
    return %arg0, %c0_i32 : i32, i32
  }
  func.func @transform_7(%arg0: i32) -> (i32, i32) {
    %c0_i32 = arith.constant 0 : i32
    %c0_i32_0 = arith.constant 0 : i32
    return %arg0, %c0_i32 : i32, i32
  }
  func.func @transform_8(%arg0: i32) -> (i32, i32) {
    %c0_i32 = arith.constant 0 : i32
    %c0_i32_0 = arith.constant 0 : i32
    return %arg0, %c0_i32 : i32, i32
  }
  func.func @transform_9(%arg0: i32) -> (i32, i32) {
    %c0_i32 = arith.constant 0 : i32
    %c0_i32_0 = arith.constant 0 : i32
    return %arg0, %c0_i32 : i32, i32
  }
  func.func @transform_10(%arg0: i32) -> (i32, i32) {
    %c0_i32 = arith.constant 0 : i32
    %c0_i32_0 = arith.constant 0 : i32
    return %arg0, %c0_i32 : i32, i32
  }
  func.func @transform_11(%arg0: i32) -> (i32, i32) {
    %c0_i32 = arith.constant 0 : i32
    %c0_i32_0 = arith.constant 0 : i32
    return %arg0, %c0_i32 : i32, i32
  }
  func.func @transform_12(%arg0: i32) -> (i32, i32) {
    %c0_i32 = arith.constant 0 : i32
    %c0_i32_0 = arith.constant 0 : i32
    return %arg0, %c0_i32 : i32, i32
  }
}

</mosaic_0001>

<bundles_post_ra>
// kernel: tpu_custom_call.1
= control target key start
LH: loop header
LB: loop body
LE: loop exit
PB: predicated region body
PF: predicated region fallthrough
CT: control target
= control target key end

     0   :  { %18 = vsyncpa [#allocation3], 0  ;;  %s1797_s0 = inlined_call_operand.hbm [shape: f32[1,1024], index: 0, kind: input, shape index: {}]   ;;  %s1798_s1 = inlined_call_operand.vmem [shape: f32[2,128], index: 1, kind: input, shape index: {}]   ;;  %s1799_s2 = inlined_call_operand.vmem [shape: f32[2,128], index: 2, kind: input, shape index: {}]   ;;  %s1800_s3 = inlined_call_operand.vmem [shape: f32[2,128], index: 3, kind: input, shape index: {}]   ;;  %s1801_s4 = inlined_call_operand.vmem [shape: f32[2,128], index: 4, kind: input, shape index: {}]   ;;  %s1802_s5 = inlined_call_operand.vmem [shape: f32[2,128], index: 5, kind: input, shape index: {}]   ;;  %s1803_s6 = inlined_call_operand.vmem [shape: f32[2,1], index: 6, kind: input, shape index: {}]   ;;  %s1804_s7 = inlined_call_operand.vmem [shape: f32[2,1], index: 7, kind: input, shape index: {}]   ;;  %s1805_s8 = inlined_call_operand.hbm [shape: f32[2,2176], index: 8, kind: output, shape index: {0}]   ;;  %s1806_s9 = inlined_call_operand.hbm [shape: f32[2,128], index: 9, kind: output, shape index: {1}]   ;;  %s1807_s10 = inlined_call_operand.hbm [shape: f32[2,128], index: 10, kind: output, shape index: {2}]   ;;  %s1808_s11 = inlined_call_operand.hbm [shape: f32[2,128], index: 11, kind: output, shape index: {3}]   ;;  %s1809_s12 = inlined_call_operand.hbm [shape: f32[2,128], index: 12, kind: output, shape index: {4}]  }
   0x1   :  { %19 = vsyncpa [#allocation4], 0 }
   0x2   :  { %20 = vsyncpa [#allocation7], 0 }
   0x3   :  { %21 = vsyncpa [#allocation10], 0  ;;  %s1276_s21 = smov [#allocation2]   ;;  %s1136_s25 = scalar_lea.hbm %s1797_s0, 128 }
   0x4   :  { %s28_s22 = sshll.u32 %s1276_s21, 4  ;;  %p1137_p0 = scmp.ne.s32.totalorder %s1797_s0, %s1136_s25  ;;  %s29_s22 = int_to_ptr.vmem [resolvable:$true] %s28_s22 }
   0x5   :  { %p1140_p1 = scmp.lt.u32.totalorder %s1136_s25, %s1797_s0 }
   0x7   :  { %p1142_p2 = pnand %p1140_p1, %p1137_p0 }
   0x9   :  { %1145 = shalt.err (!%p1142_p2)
}
   0xa   :  { %s1146_s30 = scalar_lea.vmem %s29_s22, 128  ;;  %p1151_p4 = scmp.lt.s32.totalorder %s29_s22, %s29_s22 }
   0xb   :  { %p1147_p3 = scmp.ne.s32.totalorder %s29_s22, %s1146_s30  ;;  %p1152_p5 = scmp.lt.s32.totalorder %s1146_s30, %s1146_s30 }
   0xd   :  { %p1153_p6 = por %p1152_p5, %p1151_p4 }
   0xf   :  { %p1154_p7 = pnand %p1153_p6, %p1147_p3 }
  0x11   :  { %1157 = shalt.err (!%p1154_p7)
}
  0x12   :  { %31 = dma.hbm_to_vmem [thread:$0]  %s1797_s0, 128, %s29_s22, [#allocation3]  }
  0x13   :  { %1268 = dma.done.wait [#allocation3], 128  }
  0x14   :  { %1269 = vsyncadd [#allocation3], 4294967168  ;;  %v1277_v0 = vmov 0   ;;  %v957_v1 = vld [vmem:[%s1803_s6] sm:$0x3] }
  0x15   :  { %1119 = vset.pattern.permute.xlu0 %v1277_v0  ;;  %v953_v2 = vld [vmem:[%s1799_s2] sm:$0x3] }
  0x16   :  { %960 = vperm.xlu0 %1119, %v957_v1   ;;  %954 = vst [vmem:[#allocation5 + $0x20] sm:$0x3] %v953_v2  ;;  %v1375_v3 = vld [vmem:[%s1801_s4] sm:$0x3] }
  0x17   :  { %v1380_v4 = vld [vmem:[%s1798_s1] sm:$0x3]  ;;  %v973_v6 = vmul.f32 %v1375_v3, %v953_v2 }
  0x18   :  { %v964_v5 = vld [vmem:[%s1804_s7] sm:$0x3]  ;;  %v50_v7 = vand.u32 2147483647, %v1380_v4  ;;  %v53_v8 = vand.u32 2139095040, %v1380_v4 }
  0x19   :  { %v977_v9 = vld [vmem:[%s1800_s3] sm:$0x3]  ;;  %v1392_v10 = vmul.f32 0.1, %v1380_v4  ;;  %974 = vst [vmem:[#allocation8] sm:$0x3] %v973_v6 }
  0x1a   :  { %v54_v11 = vshrl.u32 %v53_v8, 23  ;;  %967 = vperm.xlu0 %1119, %v964_v5   ;;  %v57_v12 = vand.u32 8388607, %v50_v7  ;;  %v1401_v15 = vld [vmem:[%s1802_s5] sm:$0x3]  ;;  %v978_v16 = vsub.f32 %v977_v9, %v953_v2  ;;  %s1278_s3 = smov [#allocation9]  }
  0x1b   :  { %v260_v13 = vand.u32 2147483647, %v1392_v10  ;;  %v263_v14 = vand.u32 2139095040, %v1392_v10  ;;  %v975_v18 = vmul.f32 %v1401_v15, %v953_v2  ;;  %s1017_s7 = sshll.u32 %s1278_s3, 4  ;;  %v1408_v25 = vmul.f32 0.01, %v1380_v4  ;;  %s1018_s7 = int_to_ptr.vmem [resolvable:$true] %s1017_s7 }
  0x1c   :  { %v1050_v17 = vadd.s32 4294967169, %v54_v11  ;;  %v979_v20 = vmul.f32 %v978_v16, %v1401_v15  ;;  %v58_v23 = vor.u32 8388608, %v57_v12  ;;  %s1158_s5 = scalar_lea.vmem %s1018_s7, 32  ;;  %p1163_p9 = scmp.lt.s32.totalorder %s1018_s7, %s1018_s7 }
  0x1d   :  { %v264_v19 = vshrl.u32 %v263_v14, 23  ;;  %v267_v22 = vand.u32 8388607, %v260_v13  ;;  %976 = vst [vmem:[#allocation9] sm:$0x3] %v975_v18  ;;  %p1159_p8 = scmp.ne.s32.totalorder %s1018_s7, %s1158_s5  ;;  %p1164_p10 = scmp.lt.s32.totalorder %s1158_s5, %s1158_s5 }
  0x1e   :  { %v60_v21 = vadd.s32 1, %v1050_v17  ;;  %980 = vst [vmem:[#allocation11] sm:$0x3] %v979_v20 }
  0x1f   :  { %v1058_v24 = vadd.s32 4294967169, %v264_v19  ;;  %p1165_p11 = por %p1164_p10, %p1163_p9 }
  0x21   :  { %p1166_p12 = pnand %p1165_p11, %p1159_p8 }
  0x23   :  { %1169 = shalt.err (!%p1166_p12)
}
  0x24   :  { %s1170_s26 = scalar_lea.hbm %s1808_s11, 32 }
  0x25   :  { %p1171_p13 = scmp.ne.s32.totalorder %s1808_s11, %s1170_s26  ;;  %p1174_p0 = scmp.lt.u32.totalorder %s1170_s26, %s1808_s11 }
  0x27   :  { %p1176_p1 = pnand %p1174_p0, %p1171_p13 }
  0x29   :  { %1179 = shalt.err (!%p1176_p1)
}
  0x2a   :  { %1020 = dma.vmem_to_hbm [thread:$0]  %s1018_s7, 32, %s1808_s11, [#allocation10]   ;;  %vm61_vm0 = vcmp.gt.s32.totalorder %v60_v21, 0  ;;  %v268_v26 = vor.u32 8388608, %v267_v22  ;;  %v270_v28 = vadd.s32 1, %v1058_v24  ;;  %v1422_v31 = vshll.u32 %v58_v23, 8 }
  0x2b   :  { %v62_v27 = vsel %vm61_vm0, %v60_v21, 0  ;;  %v473_v33 = vand.u32 2139095040, %v1408_v25  ;;  %v1279_v35 = vmov 683565275   ;;  %v1280_v37 = vmov 2475754826  }
  0x2c   :  { %v63_v29 = vshrl.u32 %v62_v27, 5  ;;  %v64_v30 = vand.u32 31, %v62_v27  ;;  %vm271_vm1 = vcmp.gt.s32.totalorder %v270_v28, 0  ;;  %v1424_v32 = vshll.u32 %v268_v26, 8  ;;  %v1082_v0 = vld [vmem:[#allocation2] ss:$0 sm:$0xff] }
  0x2d   :  { %v1281_v39 = vmov 2131351028   ;;  %v1282_v41 = vmov 2102212464   ;;  %v1283_v43 = vmov 920167782  }
  0x2e   :  { %v65_v34 = vsub.s32 32, %v64_v30  ;;  %v67_v36 = vshll.u32 %v1279_v35, %v64_v30  ;;  %v70_v38 = vshll.u32 %v1280_v37, %v64_v30  ;;  %v73_v40 = vshll.u32 %v1281_v39, %v64_v30  ;;  %v1083_v1 = vld [vmem:[#allocation2 + $0x1] ss:$0 sm:$0xff]  ;;  %896 = vst [vmem:[#allocation5 + $0x10] sm:$0x3] %v1082_v0  ;;  %s1285_s11 = smov [#allocation11]  }
  0x2f   :  { %v76_v42 = vshll.u32 %v1282_v41, %v64_v30  ;;  %v79_v44 = vshll.u32 %v1283_v43, %v64_v30  ;;  %vm82_vm2 = vcmp.lt.s32.totalorder %v63_v29, 1  ;;  %vm83_vm3 = vcmp.lt.s32.totalorder %v63_v29, 2  ;;  %904 = vst [vmem:[#allocation5 + $0x12] sm:$0x3] %v1083_v1  ;;  %v1084_v16 = vld [vmem:[#allocation2 + $0x2] ss:$0 sm:$0xff] }
  0x30   :  { %v66_v45 = vshrl.u32 %v1279_v35, %v65_v34  ;;  %v68_v46 = vshrl.u32 %v1280_v37, %v65_v34  ;;  %v71_v47 = vshrl.u32 %v1281_v39, %v65_v34  ;;  %v74_v48 = vshrl.u32 %v1282_v41, %v65_v34  ;;  %v1085_v17 = vld [vmem:[#allocation2 + $0x3] ss:$0 sm:$0xff]  ;;  %v1086_v18 = vld [vmem:[#allocation2 + $0x4] ss:$0 sm:$0xff]  ;;  %912 = vst [vmem:[#allocation5 + $0x14] sm:$0x3] %v1084_v16 }
  0x31   :  { %v77_v49 = vshrl.u32 %v1283_v43, %v65_v34  ;;  %v1284_v50 = vmov 1326507024   ;;  %vm84_vm4 = vcmp.lt.s32.totalorder %v63_v29, 3  ;;  %vm85_vm5 = vcmp.lt.s32.totalorder %v63_v29, 4  ;;  %920 = vst [vmem:[#allocation5 + $0x16] sm:$0x3] %v1085_v17 }
  0x32   :  { %v80_v51 = vshrl.u32 %v1284_v50, %v65_v34  ;;  %v69_v52 = vor.u32 %v68_v46, %v67_v36  ;;  %v72_v53 = vor.u32 %v71_v47, %v70_v38  ;;  %v75_v54 = vor.u32 %v74_v48, %v73_v40  ;;  %928 = vst [vmem:[#allocation5 + $0x18] sm:$0x3] %v1086_v18  ;;  %v1087_v23 = vld [vmem:[#allocation2 + $0x5] ss:$0 sm:$0xff]  ;;  %v1088_v24 = vld [vmem:[#allocation2 + $0x6] ss:$0 sm:$0xff] }
  0x33   :  { %v272_v55 = vsel %vm271_vm1, %v270_v28, 0  ;;  %v78_v56 = vor.u32 %v77_v49, %v76_v42  ;;  %v1089_v26 = vld [vmem:[#allocation2 + $0x7] ss:$0 sm:$0xff]  ;;  %936 = vst [vmem:[#allocation5 + $0x1a] sm:$0x3] %v1087_v23  ;;  %s1027_s15 = sshll.u32 %s1285_s11, 4  ;;  %s1028_s15 = int_to_ptr.vmem [resolvable:$true] %s1027_s15 }
  0x34   :  { %v81_v57 = vor.u32 %v80_v51, %v79_v44  ;;  %v1439_v58 = vshrl.u32 %v272_v55, 5  ;;  %v274_v59 = vand.u32 31, %v272_v55  ;;  %v86_v60 = vsel %vm82_vm2, %v66_v45, %v69_v52  ;;  %944 = vst [vmem:[#allocation5 + $0x1c] sm:$0x3] %v1088_v24  ;;  %952 = vst [vmem:[#allocation5 + $0x1e] sm:$0x3] %v1089_v26  ;;  %p1185_p3 = scmp.lt.s32.totalorder %s1028_s15, %s1028_s15 }
  0x35   :  { %v87_v61 = vsel %vm85_vm5, %v75_v54, 2102212464  ;;  %v90_v62 = vsel %vm82_vm2, %v69_v52, %v72_v53  ;;  %v94_v63 = vsel %vm82_vm2, %v72_v53, %v75_v54  ;;  %v91_v5 = vsel %vm85_vm5, %v78_v56, 920167782  ;;  %s1180_s16 = scalar_lea.vmem %s1028_s15, 32 }
  0x36   :  { %v88_v2 = vsel %vm84_vm4, %v72_v53, %v87_v61  ;;  %v95_v6 = vsel %vm85_vm5, %v81_v57, 1326507024  ;;  %v275_v8 = vsub.s32 32, %v274_v59  ;;  %v92_v11 = vsel %vm84_vm4, %v75_v54, %v91_v5  ;;  %p1181_p2 = scmp.ne.s32.totalorder %s1028_s15, %s1180_s16  ;;  %p1186_p4 = scmp.lt.s32.totalorder %s1180_s16, %s1180_s16 }
  0x37   :  { %v1449_v9 = vsel %vm83_vm3, %v86_v60, %v88_v2  ;;  %v96_v12 = vsel %vm84_vm4, %v78_v56, %v95_v6  ;;  %v277_v14 = vshll.u32 %v1279_v35, %v274_v59  ;;  %v93_v19 = vsel %vm83_vm3, %v90_v62, %v92_v11 }
  0x38   :  { %v97_v20 = vsel %vm83_vm3, %v94_v63, %v96_v12  ;;  %v105_v21 = vmul.u32 %v1422_v31, %v1449_v9  ;;  %v276_v22 = vshrl.u32 %v1279_v35, %v275_v8  ;;  %v278_v29 = vshrl.u32 %v1280_v37, %v275_v8  ;;  %p1187_p5 = por %p1186_p4, %p1185_p3 }
  0x39   :  { %v1460_v27 = vmul.u32.u64.low %v1422_v31, %v97_v20  ;;  %v1461_v28 = vmul.u32.u64.high %v1422_v31, %v97_v20, %v1460_v27  ;;  %v1464_v30 = vmul.u32.u64.low %v1422_v31, %v93_v19  ;;  %v1465_v34 = vmul.u32.u64.high %v1422_v31, %v93_v19, %v1464_v30 }
  0x3a   :  { %v280_v36 = vshll.u32 %v1280_v37, %v274_v59  ;;  %v281_v38 = vshrl.u32 %v1281_v39, %v275_v8  ;;  %v283_v40 = vshll.u32 %v1281_v39, %v274_v59  ;;  %v284_v42 = vshrl.u32 %v1282_v41, %v275_v8  ;;  %p1188_p6 = pnand %p1187_p5, %p1181_p2 }
  0x3b   :  { %v286_v44 = vshll.u32 %v1282_v41, %v274_v59  ;;  %v287_v31 = vshrl.u32 %v1283_v43, %v275_v8  ;;  %v289_v45 = vshll.u32 %v1283_v43, %v274_v59  ;;  %v279_v46 = vor.u32 %v278_v29, %v277_v14 }
  0x3c   :  { %v282_v47 = vor.u32 %v281_v38, %v280_v36  ;;  %v290_v48 = vshrl.u32 %v1284_v50, %v275_v8  ;;  %vm292_vm6 = vcmp.lt.s32.totalorder %v1439_v58, 1 }
  0x3d   :  { %1191 = shalt.err (!%p1188_p6)
}
  0x3e   :  { %s1192_s19 = scalar_lea.hbm %s1809_s12, 32 }
  0x3f   :  { %p1193_p7 = scmp.ne.s32.totalorder %s1809_s12, %s1192_s19  ;;  %p1196_p8 = scmp.lt.u32.totalorder %s1192_s19, %s1809_s12 }
  0x41   :  { %p1198_p9 = pnand %p1196_p8, %p1193_p7 }
  0x43   :  { %1201 = shalt.err (!%p1198_p9)
}
  0x44   :  { %1030 = dma.vmem_to_hbm [thread:$0]  %s1028_s15, 32, %s1809_s12, [#allocation10]   ;;  %vm107_vm7 = vc.u32 %v1461_v28, %v1464_v30  ;;  %v108_v49 = vadd.s32 1, %v1465_v34  ;;  %v285_v51 = vor.u32 %v284_v42, %v283_v40  ;;  %v474_v52 = vshrl.u32 %v473_v33, 23 }
  0x45   :  { %v288_v53 = vor.u32 %v287_v31, %v286_v44  ;;  %v291_v54 = vor.u32 %v290_v48, %v289_v45  ;;  %vm293_vm8 = vcmp.lt.s32.totalorder %v1439_v58, 2  ;;  %vm294_vm9 = vcmp.lt.s32.totalorder %v1439_v58, 3  ;;  %s1286_s12 = smov [#allocation6]   ;;  %s1287_s1 = smov [#allocation8]  }
  0x46   :  { %v109_v55 = vsel %vm107_vm7, %v108_v49, %v1465_v34  ;;  %vm295_vm10 = vcmp.lt.s32.totalorder %v1439_v58, 4  ;;  %v296_v56 = vsel %vm292_vm6, %v276_v22, %v279_v46  ;;  %v300_v57 = vsel %vm292_vm6, %v279_v46, %v282_v47  ;;  %s997_s6 = sshll.u32 %s1286_s12, 4  ;;  %s1007_s4 = sshll.u32 %s1287_s1, 4  ;;  %s998_s6 = int_to_ptr.vmem [resolvable:$true] %s997_s6  ;;  %s1753_s4 = int_to_ptr.vmem [resolvable:$true] %s1007_s4 }
  0x47   :  { %v110_v59 = vadd.s32 %v109_v55, %v105_v21  ;;  %v297_v60 = vsel %vm295_vm10, %v285_v51, 2102212464  ;;  %v301_v61 = vsel %vm295_vm10, %v288_v53, 920167782  ;;  %v304_v33 = vsel %vm292_vm6, %v282_v47, %v285_v51  ;;  %s1202_s3 = scalar_lea.vmem %s998_s6, 32  ;;  %p1207_p11 = scmp.lt.s32.totalorder %s998_s6, %s998_s6 }
  0x48   :  { %v298_v62 = vsel %vm294_vm9, %v282_v47, %v297_v60  ;;  %v302_v63 = vsel %vm294_vm9, %v285_v51, %v301_v61  ;;  %v305_v0 = vsel %vm295_vm10, %v291_v54, 1326507024  ;;  %v1066_v1 = vadd.s32 4294967169, %v474_v52  ;;  %p1203_p10 = scmp.ne.s32.totalorder %s998_s6, %s1202_s3  ;;  %p1208_p12 = scmp.lt.s32.totalorder %s1202_s3, %s1202_s3 }
  0x49   :  { %v111_v2 = vadd.s32 536870912, %v110_v59  ;;  %v303_v5 = vsel %vm293_vm8, %v300_v57, %v302_v63  ;;  %v306_v6 = vsel %vm294_vm9, %v288_v53, %v305_v0  ;;  %v470_v8 = vand.u32 2147483647, %v1408_v25 }
  0x4a   :  { %v299_v9 = vsel %vm293_vm8, %v296_v56, %v298_v62  ;;  %v307_v11 = vsel %vm293_vm8, %v304_v33, %v306_v6  ;;  %v1513_v12 = vmul.u32.u64.low %v1424_v32, %v303_v5  ;;  %v1514_v14 = vmul.u32.u64.high %v1424_v32, %v303_v5, %v1513_v12  ;;  %p1209_p13 = por %p1208_p12, %p1207_p11 }
  0x4b   :  { %v112_v16 = vshrl.u32 %v111_v2, 30  ;;  %v1517_v17 = vmul.u32.u64.low %v1424_v32, %v307_v11  ;;  %v1518_v18 = vmul.u32.u64.high %v1424_v32, %v307_v11, %v1517_v17  ;;  %v480_v19 = vadd.s32 1, %v1066_v1 }
  0x4c   :  { %v315_v21 = vmul.u32 %v1424_v32, %v299_v9  ;;  %v318_v22 = vadd.s32 1, %v1514_v14  ;;  %v477_v58 = vand.u32 8388607, %v470_v8  ;;  %v1525_v24 = vmul.f32 0.001, %v1380_v4  ;;  %p1210_p0 = pnand %p1209_p13, %p1203_p10 }
  0x4d   :  { %v113_v20 = vshll.u32 %v112_v16, 30  ;;  %vm481_vm11 = vcmp.gt.s32.totalorder %v480_v19, 0  ;;  %vm317_vm12 = vc.u32 %v1518_v18, %v1513_v12  ;;  %v136_v27 = vsub.s32 4, %v112_v16 }
  0x4e   :  { %v482_v23 = vsel %vm481_vm11, %v480_v19, 0  ;;  %v319_v34 = vsel %vm317_vm12, %v318_v22, %v1514_v14  ;;  %v478_v32 = vor.u32 8388608, %v477_v58  ;;  %v680_v40 = vand.u32 2147483647, %v1525_v24 }
  0x4f   :  { %v114_v26 = vsub.s32 %v110_v59, %v113_v20  ;;  %v484_v29 = vand.u32 31, %v482_v23  ;;  %v320_v38 = vadd.s32 %v319_v34, %v315_v21  ;;  %v683_v42 = vand.u32 2139095040, %v1525_v24 }
  0x50   :  { %vm52_vm13 = vcmp.lt.s32.totalorder %v1380_v4, 0  ;;  %vm1536_vm14 = vcmp.le.f32.partialorder %v50_v7, 0.7853982  ;;  %v106_v48 = vadd.s32 %v1464_v30, %v1461_v28  ;;  %v1542_v52 = vshll.u32 %v478_v32, 8 }
  0x51   :  { %v116_v36 = vsub.s32 0, %v114_v26  ;;  %v137_v31 = vsel %vm52_vm13, %v136_v27, %v112_v16  ;;  %v321_v45 = vadd.s32 536870912, %v320_v38  ;;  %v485_v46 = vsub.s32 32, %v484_v29 }
  0x52   :  { %v1544_v53 = vshrl.u32 %v683_v42, 23  ;;  %v1548_v54 = vand.u32 8388607, %v680_v40  ;;  %v1552_v7 = vsel %vm1536_vm14, 0, %v137_v31  ;;  %v1554_v56 = vshrl.u32 %v482_v23, 5 }
  0x53   :  { %v1051_v44 = vmin.u32 %v116_v36, %v114_v26  ;;  %v322_v51 = vshrl.u32 %v321_v45, 30  ;;  %v487_v57 = vshll.u32 %v1279_v35, %v484_v29  ;;  %v488_v30 = vshrl.u32 %v1280_v37, %v485_v46 }
  0x54   :  { %v490_v59 = vshll.u32 %v1280_v37, %v484_v29  ;;  %v493_v60 = vshll.u32 %v1281_v39, %v484_v29  ;;  %v491_v61 = vshrl.u32 %v1281_v39, %v485_v46  ;;  %v494_v33 = vshrl.u32 %v1282_v41, %v485_v46 }
  0x55   :  { %v118_v49 = vclz %v1051_v44  ;;  %v323_v28 = vshll.u32 %v322_v51, 30  ;;  %v496_v62 = vshll.u32 %v1282_v41, %v484_v29  ;;  %v497_v1 = vshrl.u32 %v1283_v43, %v485_v46 }
  0x56   :  { %v499_v2 = vshll.u32 %v1283_v43, %v484_v29  ;;  %vm262_vm0 = vcmp.lt.s32.totalorder %v1392_v10, 0  ;;  %v500_v11 = vshrl.u32 %v1284_v50, %v485_v46  ;;  %v143_v14 = vadd.s32 3, %v1552_v7 }
  0x57   :  { %v1052_v55 = vadd.s32 4294967294, %v118_v49  ;;  %v1563_v0 = vsub.s32 %v320_v38, %v323_v28  ;;  %v316_v16 = vadd.s32 %v1513_v12, %v1518_v18  ;;  %v486_v19 = vshrl.u32 %v1279_v35, %v485_v46 }
  0x58   :  { %v489_v22 = vor.u32 %v488_v30, %v487_v57  ;;  %v492_v58 = vor.u32 %v491_v61, %v490_v59  ;;  %v498_v27 = vor.u32 %v497_v1, %v496_v62  ;;  %vm502_vm1 = vcmp.lt.s32.totalorder %v1554_v56, 1 }
  0x59   :  { %vm1053_vm15 = vcmp.lt.s32.totalorder %v1052_v55, 0  ;;  %v326_v17 = vsub.s32 0, %v1563_v0  ;;  %v501_v36 = vor.u32 %v500_v11, %v499_v2  ;;  %vm505_vm2 = vcmp.lt.s32.totalorder %v1554_v56, 4 }
  0x5a   :  { %v121_v63 = vsel %vm1053_vm15, 0, %v1052_v55  ;;  %v346_v18 = vsub.s32 4, %v322_v51  ;;  %vm503_vm3 = vcmp.lt.s32.totalorder %v1554_v56, 2  ;;  %vm504_vm4 = vcmp.lt.s32.totalorder %v1554_v56, 3 }
  0x5b   :  { %v122_v5 = vsub.s32 32, %v121_v63  ;;  %v123_v6 = vshll.u32 %v114_v26, %v121_v63  ;;  %v126_v9 = vsub.s32 4294967266, %v121_v63  ;;  %v1059_v23 = vmin.u32 %v326_v17, %v1563_v0 }
  0x5c   :  { %v495_v26 = vor.u32 %v494_v33, %v493_v60  ;;  %v510_v44 = vsel %vm502_vm1, %v489_v22, %v492_v58  ;;  %vm1584_vm5 = vcmp.le.f32.partialorder %v260_v13, 0.7853982  ;;  %v506_v46 = vsel %vm502_vm1, %v486_v19, %v489_v22 }
  0x5d   :  { %v124_v20 = vshrl.u32 %v106_v48, %v122_v5  ;;  %v127_v21 = vadd.s32 127, %v126_v9  ;;  %v328_v12 = vclz %v1059_v23  ;;  %v511_v48 = vsel %vm505_vm2, %v498_v27, 920167782 }
  0x5e   :  { %v507_v42 = vsel %vm505_vm2, %v495_v26, 2102212464  ;;  %v514_v49 = vsel %vm502_vm1, %v492_v58, %v495_v26  ;;  %v512_v13 = vsel %vm504_vm4, %v495_v26, %v511_v48  ;;  %v515_v28 = vsel %vm505_vm2, %v501_v36, 1326507024 }
  0x5f   :  { %v125_v34 = vor.u32 %v124_v20, %v123_v6  ;;  %v128_v29 = vshll.u32 %v127_v21, 23  ;;  %v1060_v45 = vadd.s32 4294967294, %v328_v12  ;;  %v508_v57 = vsel %vm504_vm4, %v492_v58, %v507_v42 }
  0x60   :  { %v347_v30 = vsel %vm262_vm0, %v346_v18, %v322_v51  ;;  %v513_v59 = vsel %vm503_vm3, %v510_v44, %v512_v13  ;;  %v516_v60 = vsel %vm504_vm4, %v498_v27, %v515_v28  ;;  %v1074_v63 = vadd.s32 4294967169, %v1544_v53 }
  0x61   :  { %v129_v38 = vor.u32 4788187, %v128_v29  ;;  %v132_v32 = vcvt.s32.f32 %v125_v34  ;;  %vm1061_vm6 = vcmp.lt.s32.totalorder %v1060_v45, 0  ;;  %v517_v62 = vsel %vm503_vm3, %v514_v49, %v516_v60 }
  0x62   :  { %v331_v33 = vsel %vm1061_vm6, 0, %v1060_v45  ;;  %v509_v51 = vsel %vm503_vm3, %v506_v46, %v508_v57  ;;  %v1613_v9 = vmul.u32.u64.low %v1542_v52, %v517_v62  ;;  %v1614_v11 = vmul.u32.u64.high %v1542_v52, %v517_v62, %v1613_v9 }
  0x63   :  { %v130_v55 = vand.u32 2147483647, %v129_v38  ;;  %v332_v1 = vsub.s32 32, %v331_v33  ;;  %v333_v2 = vshll.u32 %v1563_v0, %v331_v33  ;;  %v336_v5 = vsub.s32 4294967266, %v331_v33 }
  0x64   :  { %v690_v17 = vadd.s32 1, %v1074_v63  ;;  %v1617_v21 = vmul.u32.u64.low %v1542_v52, %v513_v59  ;;  %v1618_v22 = vmul.u32.u64.high %v1542_v52, %v513_v59, %v1617_v21  ;;  %v1623_v0 = vand.u32 3, %v143_v14 }
  0x65   :  { %v133_v61 = vmul.f32 %v132_v32, %v130_v55  ;;  %v334_v19 = vshrl.u32 %v316_v16, %v332_v1  ;;  %v337_v20 = vadd.s32 127, %v336_v5  ;;  %v1626_v56 = vand.u32 3, %v1552_v7 }
  0x66   :  { %vm691_vm7 = vcmp.gt.s32.totalorder %v690_v17, 0  ;;  %v349_v27 = vsel %vm1584_vm5, 0, %v347_v30  ;;  %v525_v34 = vmul.u32 %v1542_v52, %v509_v51  ;;  %vm527_vm8 = vc.u32 %v1614_v11, %v1617_v21 }
  0x67   :  { %v134_v6 = vxor.u32 2147483648, %v133_v61  ;;  %v335_v16 = vor.u32 %v334_v19, %v333_v2  ;;  %v338_v23 = vshll.u32 %v337_v20, 23  ;;  %v692_v26 = vsel %vm691_vm7, %v690_v17, 0 }
  0x68   :  { %v528_v29 = vadd.s32 1, %v1618_v22  ;;  %vm149_vm9 = vcmp.eq.s32.totalorder %v1623_v0, 2  ;;  %vm253_vm10 = vcmp.eq.s32.totalorder %v1626_v56, 2  ;;  %v688_v47 = vor.u32 8388608, %v1548_v54 }
  0x69   :  { %v135_v53 = vsel %vm52_vm13, %v134_v6, %v133_v61  ;;  %v339_v7 = vor.u32 4788187, %v338_v23  ;;  %v342_v14 = vcvt.s32.f32 %v335_v16  ;;  %v694_v36 = vand.u32 31, %v692_v26 }
  0x6a   :  { %v138_v58 = vsel %vm1536_vm14, %v1380_v4, %v135_v53  ;;  %vm146_vm11 = vcmp.eq.s32.totalorder %v1623_v0, 0  ;;  %vm250_vm12 = vcmp.eq.s32.totalorder %v1626_v56, 0  ;;  %v353_v12 = vadd.s32 3, %v349_v27 }
  0x6b   :  { %1120 = vcosq.f32 %v138_v58  ;;  %v340_v52 = vand.u32 2147483647, %v339_v7  ;;  %v529_v18 = vsel %vm527_vm8, %v528_v29, %v1618_v22  ;;  %v1643_v38 = vshrl.u32 %v692_v26, 5 }
  0x6c   :  { %1122 = vsinq.f32 %v138_v58  ;;  %vm145_vm13 = vcmp.lt.s32.totalorder %v1623_v0, 2  ;;  %vm249_vm14 = vcmp.lt.s32.totalorder %v1626_v56, 2  ;;  %v530_v32 = vadd.s32 %v529_v18, %v525_v34 }
  0x6d   :  { %v695_v42 = vsub.s32 32, %v694_v36  ;;  %v697_v44 = vshll.u32 %v1279_v35, %v694_v36  ;;  %v700_v45 = vshll.u32 %v1280_v37, %v694_v36  ;;  %vm142_vm15 = vweird.f32 %v1380_v4 }
  0x6e   :  { %v343_v46 = vmul.f32 %v342_v14, %v340_v52  ;;  %v703_v48 = vshll.u32 %v1281_v39, %v694_v36  ;;  %v706_v49 = vshll.u32 %v1282_v41, %v694_v36  ;;  %v709_v55 = vshll.u32 %v1283_v43, %v694_v36 }
  0x6f   :  { %v531_v57 = vadd.s32 536870912, %v530_v32  ;;  %v696_v13 = vshrl.u32 %v1279_v35, %v695_v42  ;;  %v698_v28 = vshrl.u32 %v1280_v37, %v695_v42  ;;  %v701_v30 = vshrl.u32 %v1281_v39, %v695_v42 }
  0x70   :  { %v344_v59 = vxor.u32 2147483648, %v343_v46  ;;  %v704_v60 = vshrl.u32 %v1282_v41, %v695_v42  ;;  %v707_v61 = vshrl.u32 %v1283_v43, %v695_v42  ;;  %v710_v33 = vshrl.u32 %v1284_v50, %v695_v42 }
  0x71   :  { %v1659_v62 = vshrl.u32 %v531_v57, 30  ;;  %v699_v63 = vor.u32 %v698_v28, %v697_v44  ;;  %v702_v1 = vor.u32 %v701_v30, %v700_v45  ;;  %vm712_vm1 = vcmp.lt.s32.totalorder %v1643_v38, 1 }
  0x72   :  { %v345_v35 = vsel %vm262_vm0, %v344_v59, %v343_v46  ;;  %v705_v2 = vor.u32 %v704_v60, %v703_v48  ;;  %v708_v37 = vor.u32 %v707_v61, %v706_v49  ;;  %v711_v5 = vor.u32 %v710_v33, %v709_v55 }
  0x73   :  { %v348_v41 = vsel %vm1584_vm5, %v1392_v10, %v345_v35  ;;  %v533_v43 = vshll.u32 %v1659_v62, 30  ;;  %vm715_vm2 = vcmp.lt.s32.totalorder %v1643_v38, 4  ;;  %v716_v50 = vsel %vm712_vm1, %v696_v13, %v699_v63 }
  0x74   :  { %1124 = vcosq.f32 %v348_v41  ;;  %v717_v9 = vsel %vm715_vm2, %v705_v2, 2102212464  ;;  %v720_v17 = vsel %vm712_vm1, %v699_v63, %v702_v1  ;;  %vm714_vm0 = vcmp.lt.s32.totalorder %v1643_v38, 3 }
  0x75   :  { %v1121_v39 = vpop.eup %1120  ;;  %1126 = vsinq.f32 %v348_v41  ;;  %v1675_v31 = vsub.s32 %v530_v32, %v533_v43  ;;  %v458_v53 = vand.u32 3, %v349_v27  ;;  %v718_v58 = vsel %vm714_vm0, %v702_v1, %v717_v9 }
  0x76   :  { %v1123_v51 = vpop.eup %1122  ;;  %v150_v6 = vxor.u32 2147483648, %v1121_v39  ;;  %vm713_vm3 = vcmp.lt.s32.totalorder %v1643_v38, 2  ;;  %v354_v27 = vand.u32 3, %v353_v12  ;;  %vm352_vm4 = vweird.f32 %v1392_v10 }
  0x77   :  { %v147_v19 = vxor.u32 2147483648, %v1123_v51  ;;  %v536_v26 = vsub.s32 0, %v1675_v31  ;;  %v719_v14 = vsel %vm713_vm3, %v716_v50, %v718_v58  ;;  %v721_v0 = vsel %vm715_vm2, %v708_v37, 920167782 }
  0x78   :  { %v151_v20 = vsel %vm149_vm9, %v150_v6, %v1123_v51  ;;  %v255_v22 = vsel %vm253_vm10, %v150_v6, %v1123_v51  ;;  %v728_v56 = vshll.u32 %v688_v47, 8  ;;  %vm459_vm5 = vcmp.lt.s32.totalorder %v458_v53, 2 }
  0x79   :  { %v148_v16 = vsel %vm146_vm11, %v1121_v39, %v147_v19  ;;  %v252_v23 = vsel %vm250_vm12, %v1121_v39, %v147_v19  ;;  %v1067_v52 = vmin.u32 %v536_v26, %v1675_v31  ;;  %vm460_vm6 = vcmp.eq.s32.totalorder %v458_v53, 0 }
  0x7a   :  { %v152_v34 = vsel %vm145_vm13, %v148_v16, %v151_v20  ;;  %v256_v7 = vsel %vm249_vm14, %v252_v23, %v255_v22  ;;  %vm463_vm7 = vcmp.eq.s32.totalorder %v458_v53, 2  ;;  %vm356_vm8 = vcmp.eq.s32.totalorder %v354_v27, 0 }
  0x7b   :  { %v153_v29 = vsel %vm142_vm15, nan, %v152_v34  ;;  %v257_v36 = vsel %vm142_vm15, nan, %v256_v7  ;;  %v538_v12 = vclz %v1067_v52  ;;  %v722_v4 = vsel %vm714_vm0, %v705_v2, %v721_v0 }
  0x7c   :  { %154 = vst [vmem:[#allocation5] sm:$0x3] %v153_v29  ;;  %258 = vst [vmem:[#allocation5 + $0x2] sm:$0x3] %v257_v36  ;;  %v724_v18 = vsel %vm712_vm1, %v702_v1, %v705_v2  ;;  %v725_v32 = vsel %vm715_vm2, %v711_v5, 1326507024  ;;  %v723_v54 = vsel %vm713_vm3, %v720_v17, %v722_v4  ;;  %v526_v45 = vadd.s32 %v1617_v21, %v1614_v11 }
  0x7d   :  { %vm359_vm9 = vcmp.eq.s32.totalorder %v354_v27, 2  ;;  %v1068_v42 = vadd.s32 4294967294, %v538_v12  ;;  %v726_v47 = vsel %vm714_vm0, %v708_v37, %v725_v32  ;;  %vm355_vm11 = vcmp.lt.s32.totalorder %v354_v27, 2 }
  0x7e   :  { %v1125_v44 = vpop.eup %1124  ;;  %v727_v46 = vsel %vm713_vm3, %v724_v18, %v726_v47  ;;  %v1720_v48 = vmul.u32.u64.low %v728_v56, %v723_v54  ;;  %v1721_v49 = vmul.u32.u64.high %v728_v56, %v723_v54, %v1720_v48  ;;  %v735_v60 = vmul.u32 %v728_v56, %v719_v14 }
  0x7f   :  { %v1127_v55 = vpop.eup %1126  ;;  %v360_v57 = vxor.u32 2147483648, %v1125_v44  ;;  %vm1069_vm10 = vcmp.lt.s32.totalorder %v1068_v42, 0  ;;  %v1723_v13 = vmul.u32.u64.low %v728_v56, %v727_v46  ;;  %v1724_v28 = vmul.u32.u64.high %v728_v56, %v727_v46, %v1723_v13 }
  0x80   :  { %v357_v30 = vxor.u32 2147483648, %v1127_v55  ;;  %v541_v59 = vsel %vm1069_vm10, 0, %v1068_v42  ;;  %v738_v35 = vadd.s32 1, %v1721_v49  ;;  %v556_v53 = vsub.s32 4, %v1659_v62 }
  0x81   :  { %v361_v61 = vsel %vm359_vm9, %v360_v57, %v1127_v55  ;;  %v465_v11 = vsel %vm463_vm7, %v360_v57, %v1127_v55  ;;  %v542_v21 = vsub.s32 32, %v541_v59  ;;  %v543_v38 = vshll.u32 %v1675_v31, %v541_v59 }
  0x82   :  { %v358_v33 = vsel %vm356_vm8, %v1125_v44, %v357_v30  ;;  %v462_v63 = vsel %vm460_vm6, %v1125_v44, %v357_v30  ;;  %v546_v1 = vsub.s32 4294967266, %v541_v59  ;;  %v736_v39 = vadd.s32 %v1720_v48, %v1724_v28 }
  0x83   :  { %v362_v2 = vsel %vm355_vm11, %v358_v33, %v361_v61  ;;  %v466_v37 = vsel %vm459_vm5, %v462_v63, %v465_v11  ;;  %v544_v5 = vshrl.u32 %v526_v45, %v542_v21  ;;  %vm737_vm12 = vc.u32 %v1724_v28, %v1720_v48 }
  0x84   :  { %v363_v41 = vsel %vm352_vm4, nan, %v362_v2  ;;  %v467_v43 = vsel %vm352_vm4, nan, %v466_v37  ;;  %v547_v50 = vadd.s32 127, %v546_v1  ;;  %v739_v6 = vsel %vm737_vm12, %v738_v35, %v1721_v49 }
  0x85   :  { %364 = vst [vmem:[#allocation5 + $0x4] sm:$0x3] %v363_v41  ;;  %468 = vst [vmem:[#allocation5 + $0x6] sm:$0x3] %v467_v43  ;;  %v545_v51 = vor.u32 %v544_v5, %v543_v38  ;;  %v740_v17 = vadd.s32 %v739_v6, %v735_v60  ;;  %vm472_vm13 = vcmp.lt.s32.totalorder %v1408_v25, 0  ;;  %vm562_vm6 = vweird.f32 %v1408_v25 }
  0x86   :  { %v548_v9 = vshll.u32 %v547_v50, 23  ;;  %vm471_vm14 = vcmp.le.f32.partialorder %v470_v8, 0.7853982  ;;  %v557_v26 = vsel %vm472_vm13, %v556_v53, %v1659_v62  ;;  %vm682_vm7 = vcmp.lt.s32.totalorder %v1525_v24, 0 }
  0x87   :  { %v552_v31 = vcvt.s32.f32 %v545_v51  ;;  %v741_v20 = vadd.s32 536870912, %v740_v17  ;;  %v559_v29 = vsel %vm471_vm14, 0, %v557_v26  ;;  %vm681_vm8 = vcmp.le.f32.partialorder %v680_v40, 0.7853982 }
  0x88   :  { %v549_v19 = vor.u32 4788187, %v548_v9  ;;  %v563_v52 = vadd.s32 3, %v559_v29  ;;  %v668_v4 = vand.u32 3, %v559_v29 }
  0x89   :  { %v742_v58 = vshrl.u32 %v741_v20, 30 }
  0x8a   :  { %v550_v22 = vand.u32 2147483647, %v549_v19  ;;  %v564_v12 = vand.u32 3, %v563_v52  ;;  %vm673_vm2 = vcmp.eq.s32.totalorder %v668_v4, 2  ;;  %vm669_vm3 = vcmp.lt.s32.totalorder %v668_v4, 2 }
  0x8b   :  { %v743_v10 = vshll.u32 %v742_v58, 30  ;;  %vm670_vm4 = vcmp.eq.s32.totalorder %v668_v4, 0  ;;  %v766_v33 = vsub.s32 4, %v742_v58 }
  0x8c   :  { %v553_v16 = vmul.f32 %v552_v31, %v550_v22  ;;  %vm569_vm1 = vcmp.eq.s32.totalorder %v564_v12, 2  ;;  %vm566_vm0 = vcmp.eq.s32.totalorder %v564_v12, 0  ;;  %vm565_vm5 = vcmp.lt.s32.totalorder %v564_v12, 2 }
  0x8d   :  { %v744_v34 = vsub.s32 %v740_v17, %v743_v10  ;;  %v767_v35 = vsel %vm682_vm7, %v766_v33, %v742_v58 }
  0x8e   :  { %v554_v23 = vxor.u32 2147483648, %v553_v16  ;;  %v769_v5 = vsel %vm681_vm8, 0, %v767_v35 }
  0x8f   :  { %v746_v27 = vsub.s32 0, %v744_v34  ;;  %v773_v50 = vadd.s32 3, %v769_v5 }
  0x90   :  { %v555_v7 = vsel %vm472_vm13, %v554_v23, %v553_v16 }
  0x91   :  { %v558_v14 = vsel %vm471_vm14, %v1408_v25, %v555_v7  ;;  %v1075_v36 = vmin.u32 %v746_v27, %v744_v34 }
  0x92   :  { %1128 = vcosq.f32 %v558_v14 }
  0x93   :  { %1130 = vsinq.f32 %v558_v14  ;;  %v748_v0 = vclz %v1075_v36 }
  0x95   :  { %v1076_v56 = vadd.s32 4294967294, %v748_v0  ;;  %v961_v1 = vpop.permute.xlu0 %960 }
  0x96   :  { %v963_v41 = vmul.f32 %v961_v1, %v1375_v3 }
  0x97   :  { %vm1077_vm15 = vcmp.lt.s32.totalorder %v1076_v56, 0 }
  0x98   :  { %v751_v18 = vsel %vm1077_vm15, 0, %v1076_v56 }
  0x99   :  { %v752_v8 = vsub.s32 32, %v751_v18  ;;  %v753_v32 = vshll.u32 %v744_v34, %v751_v18  ;;  %v756_v42 = vsub.s32 4294967266, %v751_v18 }
  0x9b   :  { %v754_v54 = vshrl.u32 %v736_v39, %v752_v8  ;;  %v757_v47 = vadd.s32 127, %v756_v42  ;;  %v968_v39 = vpop.permute.xlu0 %967 }
  0x9c   :  { %v1129_v62 = vpop.eup %1128  ;;  %v970_v43 = vmul.f32 %v968_v39, %v1401_v15 }
  0x9d   :  { %v1131_v44 = vpop.eup %1130  ;;  %v570_v45 = vxor.u32 2147483648, %v1129_v62  ;;  %v755_v48 = vor.u32 %v754_v54, %v753_v32  ;;  %v758_v49 = vshll.u32 %v757_v47, 23 }
  0x9e   :  { %v567_v46 = vxor.u32 2147483648, %v1131_v44  ;;  %v971_v51 = vadd.f32 %v970_v43, %v963_v41 }
  0x9f   :  { %v571_v55 = vsel %vm569_vm1, %v570_v45, %v1131_v44  ;;  %v675_v57 = vsel %vm673_vm2, %v570_v45, %v1131_v44  ;;  %v759_v30 = vor.u32 4788187, %v758_v49  ;;  %v762_v59 = vcvt.s32.f32 %v755_v48 }
  0xa0   :  { %v568_v13 = vsel %vm566_vm0, %v1129_v62, %v567_v46  ;;  %v672_v28 = vsel %vm670_vm4, %v1129_v62, %v567_v46  ;;  %972 = vst [vmem:[#allocation6] sm:$0x3] %v971_v51 }
  0xa1   :  { %v572_v60 = vsel %vm565_vm5, %v568_v13, %v571_v55  ;;  %v676_v61 = vsel %vm669_vm3, %v672_v28, %v675_v57  ;;  %v760_v38 = vand.u32 2147483647, %v759_v30 }
  0xa2   :  { %v573_v11 = vsel %vm562_vm6, nan, %v572_v60  ;;  %v677_v21 = vsel %vm562_vm6, nan, %v676_v61 }
  0xa3   :  { %574 = vst [vmem:[#allocation5 + $0x8] sm:$0x3] %v573_v11  ;;  %678 = vst [vmem:[#allocation5 + $0xa] sm:$0x3] %v677_v21  ;;  %v763_v63 = vmul.f32 %v762_v59, %v760_v38 }
  0xa5   :  { %v764_v25 = vxor.u32 2147483648, %v763_v63 }
  0xa7   :  { %v765_v2 = vsel %vm682_vm7, %v764_v25, %v763_v63 }
  0xa8   :  { %v768_v37 = vsel %vm681_vm8, %v1525_v24, %v765_v2 }
  0xa9   :  { %1132 = vcosq.f32 %v768_v37 }
  0xaa   :  { %1134 = vsinq.f32 %v768_v37 }
  0xab   :  { %1213 = shalt.err (!%p1210_p0)
}
  0xac   :  { %s1214_s24 = scalar_lea.hbm %s1806_s9, 32 }
  0xad   :  { %p1215_p1 = scmp.ne.s32.totalorder %s1806_s9, %s1214_s24  ;;  %p1218_p2 = scmp.lt.u32.totalorder %s1214_s24, %s1806_s9 }
  0xaf   :  { %p1220_p3 = pnand %p1218_p2, %p1215_p1 }
  0xb1   :  { %1223 = shalt.err (!%p1220_p3)
}
  0xb2   :  { %1000 = dma.vmem_to_hbm [thread:$0]  %s998_s6, 32, %s1806_s9, [#allocation7]   ;;  %v774_v3 = vand.u32 3, %v773_v50  ;;  %v878_v15 = vand.u32 3, %v769_v5 }
  0xb3   :  { %s1224_s13 = scalar_lea.vmem %s1753_s4, 32  ;;  %p1229_p5 = scmp.lt.s32.totalorder %s1753_s4, %s1753_s4 }
  0xb4   :  { %p1225_p4 = scmp.ne.s32.totalorder %s1753_s4, %s1224_s13  ;;  %p1230_p6 = scmp.lt.s32.totalorder %s1224_s13, %s1224_s13 }
  0xb6   :  { %p1231_p7 = por %p1230_p6, %p1229_p5 }
  0xb8   :  { %p1232_p8 = pnand %p1231_p7, %p1225_p4 }
  0xba   :  { %1235 = shalt.err (!%p1232_p8)
}
  0xbb   :  { %s1236_s15 = scalar_lea.hbm %s1807_s10, 32 }
  0xbc   :  { %p1237_p9 = scmp.ne.s32.totalorder %s1807_s10, %s1236_s15  ;;  %p1240_p10 = scmp.lt.u32.totalorder %s1236_s15, %s1807_s10 }
  0xbe   :  { %p1242_p11 = pnand %p1240_p10, %p1237_p9 }
  0xc0   :  { %1245 = shalt.err (!%p1242_p11)
}
  0xc1   :  { %1010 = dma.vmem_to_hbm [thread:$0]  %s1753_s4, 32, %s1807_s10, [#allocation7]   ;;  %v1133_v40 = vpop.eup %1132  ;;  %vm779_vm9 = vcmp.eq.s32.totalorder %v774_v3, 2  ;;  %vm883_vm10 = vcmp.eq.s32.totalorder %v878_v15, 2  ;;  %vm776_vm11 = vcmp.eq.s32.totalorder %v774_v3, 0  ;;  %vm880_vm12 = vcmp.eq.s32.totalorder %v878_v15, 0 }
  0xc2   :  { %v1135_v6 = vpop.eup %1134  ;;  %v780_v9 = vxor.u32 2147483648, %v1133_v40  ;;  %vm775_vm13 = vcmp.lt.s32.totalorder %v774_v3, 2  ;;  %vm879_vm14 = vcmp.lt.s32.totalorder %v878_v15, 2  ;;  %s1288_s0 = smov [#allocation5]   ;;  %vm772_vm15 = vweird.f32 %v1525_v24 }
  0xc3   :  { %v777_v17 = vxor.u32 2147483648, %v1135_v6  ;;  %s987_s21 = sshll.u32 %s1288_s0, 4  ;;  %s988_s21 = int_to_ptr.vmem [resolvable:$true] %s987_s21 }
  0xc4   :  { %v781_v19 = vsel %vm779_vm9, %v780_v9, %v1135_v6  ;;  %v885_v31 = vsel %vm883_vm10, %v780_v9, %v1135_v6  ;;  %s1246_s10 = scalar_lea.vmem %s988_s21, 544  ;;  %p1251_p13 = scmp.lt.s32.totalorder %s988_s21, %s988_s21 }
  0xc5   :  { %v778_v20 = vsel %vm776_vm11, %v1133_v40, %v777_v17  ;;  %v882_v22 = vsel %vm880_vm12, %v1133_v40, %v777_v17  ;;  %p1247_p12 = scmp.ne.s32.totalorder %s988_s21, %s1246_s10  ;;  %p1252_p0 = scmp.lt.s32.totalorder %s1246_s10, %s1246_s10 }
  0xc6   :  { %v782_v53 = vsel %vm775_vm13, %v778_v20, %v781_v19  ;;  %v886_v58 = vsel %vm879_vm14, %v882_v22, %v885_v31 }
  0xc7   :  { %v783_v16 = vsel %vm772_vm15, nan, %v782_v53  ;;  %v887_v10 = vsel %vm772_vm15, nan, %v886_v58  ;;  %p1253_p1 = por %p1252_p0, %p1251_p13 }
  0xc8   :  { %784 = vst [vmem:[#allocation5 + $0xc] sm:$0x3] %v783_v16  ;;  %888 = vst [vmem:[#allocation5 + $0xe] sm:$0x3] %v887_v10 }
  0xc9   :  { %p1254_p2 = pnand %p1253_p1, %p1247_p12 }
  0xcb   :  { %1257 = shalt.err (!%p1254_p2)
}
  0xcc   :  { %s1258_s2 = scalar_lea.hbm %s1805_s8, 544 }
  0xcd   :  { %p1259_p3 = scmp.ne.s32.totalorder %s1805_s8, %s1258_s2  ;;  %p1262_p4 = scmp.lt.u32.totalorder %s1258_s2, %s1805_s8 }
  0xcf   :  { %p1264_p5 = pnand %p1262_p4, %p1259_p3 }
  0xd1   :  { %1267 = shalt.err (!%p1264_p5)
}
  0xd2   :  { %990 = dma.vmem_to_hbm [thread:$0]  %s988_s21, 544, %s1805_s8, [#allocation4]  }
  0xd3   :  { %1270 = dma.done.wait [#allocation4], 544  }
  0xd4   :  { %1271 = vsyncadd [#allocation4], 4294966752 }
  0xd5   :  { %1272 = dma.done.wait [#allocation7], 64  }
  0xd6   :  { %1273 = vsyncadd [#allocation7], 4294967232 }
  0xd7   :  { %1274 = dma.done.wait [#allocation10], 64  }
  0xd8   :  { %1275 = vsyncadd [#allocation10], 4294967232 }
  0xd9   :  { %1046 = vsyncpa [#allocation3], 1 }
  0xda   :  { %1047 = vsyncpa [#allocation4], 1 }
  0xdb   :  { %1048 = vsyncpa [#allocation7], 1 }
  0xdc   :  { %1049 = vsyncpa [#allocation10], 1 }

</bundles_post_ra>
